<compile_context>
chip_gen: v6e
topology: v6e:2x2x1
jax: 0.10.0
libtpu: 0.0.40
codegen_flags: <defaults>
</compile_context>

<pallas_src>
from typing import NamedTuple

import jax
import jax.numpy as jnp
from jax.experimental import pallas as pl
from jax.experimental.pallas import tpu as pltpu


def _round_up(x, m):
    return (x + m - 1) // m * m


def _vmem_capacity_bytes():
    # Trace-time hardware query; conservative 64 MiB (v7x per-TC) fallback.
    try:
        return int(pltpu.get_tpu_info().vmem_capacity_bytes)
    except Exception:
        return 64 * 1024 * 1024


class OutLayerParams(NamedTuple):
    w1: jax.Array   # [d_in_p, d_hid_p]
    b1: jax.Array   # [1, d_hid_p]
    w2: jax.Array   # [d_hid_p, d_out_p]
    b2: jax.Array   # [1, d_out_p]
    d_in: int
    d_hidden: int
    d_out: int


def prepare_out_layer_params(w1, b1, w2, b2, *, compute_dtype=None):
    """Pad weights/biases ONCE to lane-dense (multiple-of-128) shapes.

    w1: [d_in, d_hidden], b1: [d_hidden]/[1, d_hidden],
    w2: [d_hidden, d_out], b2: [d_out]/[1, d_out].
    Zero padding is exact: padded rows/cols contribute nothing and ReLU(0)=0.
    Optional compute_dtype (e.g. jnp.bfloat16) casts stored weights for the
    faster MXU path; f32 accumulation is kept inside the kernel.
    """
    d_in, d_hidden = w1.shape
    d_out = w2.shape[1]
    d_in_p = _round_up(d_in, 128)
    d_hid_p = _round_up(d_hidden, 128)
    d_out_p = _round_up(d_out, 128)

    def _pad2(a, rows, cols):
        pr, pc = rows - a.shape[0], cols - a.shape[1]
        return jnp.pad(a, ((0, pr), (0, pc))) if (pr or pc) else a

    w1_p = _pad2(w1, d_in_p, d_hid_p)
    b1_p = _pad2(jnp.reshape(b1, (1, -1)), 1, d_hid_p)
    w2_p = _pad2(w2, d_hid_p, d_out_p)
    b2_p = _pad2(jnp.reshape(b2, (1, -1)), 1, d_out_p)
    if compute_dtype is not None:
        w1_p = w1_p.astype(compute_dtype)
        w2_p = w2_p.astype(compute_dtype)
    return OutLayerParams(w1_p, b1_p, w2_p, b2_p, d_in, d_hidden, d_out)


def _out_layer_kernel(x_ref, w1_ref, b1_ref, w2_ref, b2_ref, o_ref, acc_ref):
    # fc_1: Linear -> ReLU -> Dropout(p=0.0, identity); fc_2: Linear.
    # TODO(synk): training-mode dropout (p > 0) would need pltpu.prng_seed +
    # pltpu.prng_random_bits; not implemented (module default p=0.0).
    j = pl.program_id(1)

    @pl.when(j == 0)
    def _():
        acc_ref[...] = jnp.zeros_like(acc_ref)

    # First matmul on the current hidden chunk, bias + ReLU, second matmul
    # accumulated into the persistent f32 scratch.
    h = jnp.dot(x_ref[...], w1_ref[...], preferred_element_type=jnp.float32)
    h = jnp.maximum(h + b1_ref[...], 0.0)
    acc_ref[...] += jnp.dot(h.astype(w2_ref.dtype), w2_ref[...],
                            preferred_element_type=jnp.float32)

    @pl.when(j == pl.num_programs(1) - 1)
    def _():
        o_ref[...] = (acc_ref[...] + b2_ref[...]).astype(o_ref.dtype)


def out_layer(x, params: OutLayerParams, *, block_m=512, hidden_chunk=None,
              out_dtype=None):
    """x: [B, d_in] -> [B, d_out] using pre-padded OutLayerParams."""
    B, d_in = x.shape
    assert d_in == params.d_in, "feature dim mismatch"
    d_in_p, d_hid_p = params.w1.shape
    d_out_p = params.w2.shape[1]
    out_dtype = out_dtype or x.dtype
    compute_dtype = params.w1.dtype

    x_itemsize = jnp.dtype(compute_dtype).itemsize
    w_itemsize = jnp.dtype(params.w1.dtype).itemsize
    o_itemsize = jnp.dtype(out_dtype).itemsize
    min_sub = {4: 8, 2: 16, 1: 32}.get(x_itemsize, 8)

    # ---- batch tile (bm) --------------------------------------------------
    r = _round_up(B, min_sub)
    bm = max(min_sub, _round_up(min(block_m, r), min_sub))
    # Prefer >= 2 batch tiles so ("parallel", ...) can shard across v7x's two
    # TensorCores (cost elsewhere: ~0.35 us extra grid step).
    if r // bm < 2 and r >= 2 * min_sub:
        bm = max(min_sub, _round_up(bm // 2, min_sub))

    # ---- VMEM-budget-driven hidden chunk (hc) ------------------------------
    vmem_cap = _vmem_capacity_bytes()
    budget = int(0.70 * vmem_cap)           # pipelining / compiler headroom

    def _footprint(bm_, hc_):
        return (2 * bm_ * d_in_p * x_itemsize             # x (double-buffered)
                + 2 * bm_ * d_out_p * o_itemsize          # out (double-buffered)
                + 2 * (d_in_p * hc_ + hc_ * d_out_p       # W1/W2 chunk (2 bufs)
                       + hc_ + d_out_p) * w_itemsize      # b1 chunk / b2
                + 4 * bm_ * d_out_p                       # f32 accumulator
                + 4 * bm_ * hc_)                          # f32 h-chunk margin

    hc_cap = d_hid_p if hidden_chunk is None else max(128, _round_up(hidden_chunk, 128))
    n128 = d_hid_p // 128
    cands = sorted((c * 128 for c in range(1, n128 + 1) if n128 % c == 0),
                   reverse=True)                          # divisors of d_hid_p
    cands = [c for c in cands if c <= hc_cap] or [128]

    hc = None
    while True:
        hc = next((c for c in cands if _footprint(bm, c) <= budget), None)
        if hc is not None or bm <= min_sub:
            break
        bm = max(min_sub, _round_up(bm // 2, min_sub))
    if hc is None:
        hc = cands[-1]    # smallest legal chunk; rely on vmem_limit headroom

    Bp = _round_up(B, bm)
    num_chunks = d_hid_p // hc
    grid = (Bp // bm, num_chunks)

    # ---- pad x only (weights were pre-padded once) -------------------------
    x_p = x.astype(compute_dtype) if x.dtype != compute_dtype else x
    if (Bp - B) or (d_in_p - d_in):
        x_p = jnp.pad(x_p, ((0, Bp - B), (0, d_in_p - d_in)))

    vmem_limit = int(min(int(0.9 * vmem_cap),
                         max(32 * 1024 * 1024, int(_footprint(bm, hc) * 1.5))))

    flops = 2 * Bp * (d_in_p * d_hid_p + d_hid_p * d_out_p)
    bytes_accessed = (Bp * d_in_p * x_itemsize + Bp * d_out_p * o_itemsize
                      + (Bp // bm) * (d_in_p * d_hid_p + d_hid_p * d_out_p
                                      + d_hid_p + d_out_p) * w_itemsize)
    cost = pl.CostEstimate(flops=flops, transcendentals=0,
                           bytes_accessed=bytes_accessed)

    y_p = pl.pallas_call(
        _out_layer_kernel,
        out_shape=jax.ShapeDtypeStruct((Bp, d_out_p), out_dtype),
        grid_spec=pltpu.PrefetchScalarGridSpec(
            num_scalar_prefetch=0,
            grid=grid,
            in_specs=[
                pl.BlockSpec((bm, d_in_p), lambda i, j: (i, 0)),     # x
                pl.BlockSpec((d_in_p, hc), lambda i, j: (0, j)),     # W1 chunk
                pl.BlockSpec((1, hc), lambda i, j: (0, j)),          # b1 chunk
                pl.BlockSpec((hc, d_out_p), lambda i, j: (j, 0)),    # W2 chunk
                pl.BlockSpec((1, d_out_p), lambda i, j: (0, 0)),     # b2
            ],
            out_specs=pl.BlockSpec((bm, d_out_p), lambda i, j: (i, 0)),
            scratch_shapes=[pltpu.VMEM((bm, d_out_p), jnp.float32)],
        ),
        compiler_params=pltpu.CompilerParams(
            dimension_semantics=("parallel", "arbitrary"),
            vmem_limit_bytes=vmem_limit),
        cost_estimate=cost,
    )(x_p, params.w1, params.b1, params.w2, params.b2)

    return y_p[:B, :params.d_out]


def make_params(key, d_in, d_hidden, d_out, bias_const=0.0, dtype=jnp.float32):
    """Deterministic synthetic init mimicking PyTorch's Linear default init."""
    k1, k2, k3 = jax.random.split(key, 3)
    bound1 = 1.0 / (d_in ** 0.5)
    bound2 = 1.0 / (d_hidden ** 0.5)
    w1 = jax.random.uniform(k1, (d_in, d_hidden), dtype, -bound1, bound1)
    b1 = jax.random.uniform(k2, (1, d_hidden), dtype, -bound1, bound1)
    w2 = jax.random.uniform(k3, (d_hidden, d_out), dtype, -bound2, bound2)
    b2 = jnp.full((1, d_out), bias_const, dtype)   # nn.init.constant_(fc_2.bias)
    return w1, b1, w2, b2


def out_layer_ref(x, w1, b1, w2, b2):
    hi = jax.lax.Precision.HIGHEST
    h = jnp.maximum(jnp.dot(x, w1, precision=hi) + b1.reshape(1, -1), 0.0)
    return jnp.dot(h, w2, precision=hi) + b2.reshape(1, -1)


if __name__ == "__main__":
    key = jax.random.PRNGKey(0)
    kx, kp, kx2, kp3, kx3 = jax.random.split(key, 5)

    # Test 1: small shapes matching the module spec.
    d_in, d_hidden, d_out = 16, 32, 8
    batch = 8
    x = jax.random.normal(kx, (batch, d_in), jnp.float32)
    w1, b1, w2, b2 = make_params(kp, d_in, d_hidden, d_out, bias_const=0.0)
    params = prepare_out_layer_params(w1, b1, w2, b2)   # pad weights ONCE

    y = jax.block_until_ready(out_layer(x, params))
    y_ref = out_layer_ref(x, w1, b1, w2, b2)
    assert y.shape == (batch, d_out)
    assert jnp.allclose(y, y_ref, atol=1e-4, rtol=1e-4)

    # Test 2: ragged batch, reusing the SAME pre-padded params (no re-pad).
    x2 = jax.random.normal(kx2, (10, d_in), jnp.float32)
    y2 = jax.block_until_ready(out_layer(x2, params))
    y2_ref = out_layer_ref(x2, w1, b1, w2, b2)
    assert y2.shape == (10, d_out)
    assert jnp.allclose(y2, y2_ref, atol=1e-4, rtol=1e-4)

    # Test 3: multiple hidden chunks + multiple batch tiles (exercises the
    # grid reduction axis, the f32 scratch accumulator reset, and bias=0.5).
    d_in3, d_hid3, d_out3, batch3 = 24, 384, 20, 24
    x3 = jax.random.normal(kx3, (batch3, d_in3), jnp.float32)
    w1c, b1c, w2c, b2c = make_params(kp3, d_in3, d_hid3, d_out3, bias_const=0.5)
    params3 = prepare_out_layer_params(w1c, b1c, w2c, b2c)
    y3 = jax.block_until_ready(out_layer(x3, params3, hidden_chunk=128))
    y3_ref = out_layer_ref(x3, w1c, b1c, w2c, b2c)
    assert y3.shape == (batch3, d_out3)
    assert jnp.allclose(y3, y3_ref, atol=1e-4, rtol=1e-4)

    print("KERNEL_OK")
</pallas_src>

<mosaic_0001>
module attributes {stable_mosaic.version = 11 : i64} {
  func.func @_out_layer_kernel(%arg0: i32, %arg1: i32, %arg2: memref<8x128xf32, #tpu.memory_space<vmem>>, %arg3: memref<128x128xf32, #tpu.memory_space<vmem>>, %arg4: memref<1x128xf32, #tpu.memory_space<vmem>>, %arg5: memref<128x128xf32, #tpu.memory_space<vmem>>, %arg6: memref<1x128xf32, #tpu.memory_space<vmem>>, %arg7: memref<8x128xf32, #tpu.memory_space<vmem>>, %arg8: memref<8x128xf32, #tpu.memory_space<vmem>>) attributes {dimension_semantics = [#tpu.dimension_semantics<parallel>, #tpu.dimension_semantics<arbitrary>], iteration_bounds = array<i64: 1, 1>, scalar_prefetch = 0 : i64, scratch_operands = 1 : i64, tpu.core_type = #tpu.core_type<tc>, window_params = [{transform_indices = @transform_0, window_bounds = array<i64: 8, 128>}, {transform_indices = @transform_1, window_bounds = array<i64: 128, 128>}, {transform_indices = @transform_2, window_bounds = array<i64: 1, 128>}, {transform_indices = @transform_3, window_bounds = array<i64: 128, 128>}, {pipeline_mode = #tpu.pipeline_mode<synchronous>, transform_indices = @transform_4, window_bounds = array<i64: 1, 128>}, {transform_indices = @transform_5, window_bounds = array<i64: 8, 128>}]} {
    %c0_i32 = arith.constant 0 : i32
    %0 = arith.cmpi eq, %arg1, %c0_i32 : i32
    %1 = arith.extui %0 : i1 to i32
    %c0_i32_0 = arith.constant 0 : i32
    %2 = arith.cmpi ne, %1, %c0_i32_0 : i32
    scf.if %2 {
      %cst_16 = arith.constant 0.000000e+00 : f32
      %19 = vector.broadcast %cst_16 : f32 to vector<8x128xf32>
      %c0_17 = arith.constant 0 : index
      %c0_18 = arith.constant 0 : index
      %20 = vector.load %arg8[%c0_17, %c0_18] : memref<8x128xf32, #tpu.memory_space<vmem>>, vector<8x128xf32>
      tpu.vector_store %arg8[%c0_17, %c0_18], %19 {strides = array<i32>} : memref<8x128xf32, #tpu.memory_space<vmem>>, vector<8x128xf32>,
    } else {
    }
    %c0 = arith.constant 0 : index
    %c0_1 = arith.constant 0 : index
    %3 = vector.load %arg2[%c0, %c0_1] : memref<8x128xf32, #tpu.memory_space<vmem>>, vector<8x128xf32>
    %c0_2 = arith.constant 0 : index
    %c0_3 = arith.constant 0 : index
    %4 = vector.load %arg3[%c0_2, %c0_3] : memref<128x128xf32, #tpu.memory_space<vmem>>, vector<128x128xf32>
    %cst = arith.constant dense<0.000000e+00> : vector<8x128xf32>
    %5 = tpu.matmul %3, %4, %cst {dimension_numbers = #tpu.dot_dimension_numbers<[1], [0], [0], [1], [0, 0, 1, 1], [], []>} : vector<8x128xf32>, vector<128x128xf32>, vector<8x128xf32> -> vector<8x128xf32>
    %c0_4 = arith.constant 0 : index
    %c0_5 = arith.constant 0 : index
    %6 = vector.load %arg4[%c0_4, %c0_5] : memref<1x128xf32, #tpu.memory_space<vmem>>, vector<1x128xf32>
    %7 = vector.broadcast %6 : vector<1x128xf32> to vector<8x128xf32>
    %8 = arith.addf %5, %7 : vector<8x128xf32>
    %cst_6 = arith.constant 0.000000e+00 : f32
    %9 = vector.broadcast %cst_6 : f32 to vector<8x128xf32>
    %10 = arith.maximumf %8, %9 : vector<8x128xf32>
    %c0_7 = arith.constant 0 : index
    %c0_8 = arith.constant 0 : index
    %11 = vector.load %arg8[%c0_7, %c0_8] : memref<8x128xf32, #tpu.memory_space<vmem>>, vector<8x128xf32>
    %c0_9 = arith.constant 0 : index
    %c0_10 = arith.constant 0 : index
    %12 = vector.load %arg5[%c0_9, %c0_10] : memref<128x128xf32, #tpu.memory_space<vmem>>, vector<128x128xf32>
    %cst_11 = arith.constant dense<0.000000e+00> : vector<8x128xf32>
    %13 = tpu.matmul %10, %12, %cst_11 {dimension_numbers = #tpu.dot_dimension_numbers<[1], [0], [0], [1], [0, 0, 1, 1], [], []>} : vector<8x128xf32>, vector<128x128xf32>, vector<8x128xf32> -> vector<8x128xf32>
    %14 = arith.addf %11, %13 : vector<8x128xf32>
    %c0_12 = arith.constant 0 : index
    %c0_13 = arith.constant 0 : index
    %15 = vector.load %arg8[%c0_12, %c0_13] : memref<8x128xf32, #tpu.memory_space<vmem>>, vector<8x128xf32>
    tpu.vector_store %arg8[%c0_12, %c0_13], %14 {strides = array<i32>} : memref<8x128xf32, #tpu.memory_space<vmem>>, vector<8x128xf32>,
    %c0_i32_14 = arith.constant 0 : i32
    %16 = arith.cmpi eq, %arg1, %c0_i32_14 : i32
    %17 = arith.extui %16 : i1 to i32
    %c0_i32_15 = arith.constant 0 : i32
    %18 = arith.cmpi ne, %17, %c0_i32_15 : i32
    scf.if %18 {
      %c0_16 = arith.constant 0 : index
      %c0_17 = arith.constant 0 : index
      %19 = vector.load %arg8[%c0_16, %c0_17] : memref<8x128xf32, #tpu.memory_space<vmem>>, vector<8x128xf32>
      %c0_18 = arith.constant 0 : index
      %c0_19 = arith.constant 0 : index
      %20 = vector.load %arg6[%c0_18, %c0_19] : memref<1x128xf32, #tpu.memory_space<vmem>>, vector<1x128xf32>
      %21 = vector.broadcast %20 : vector<1x128xf32> to vector<8x128xf32>
      %22 = arith.addf %19, %21 : vector<8x128xf32>
      %c0_20 = arith.constant 0 : index
      %c0_21 = arith.constant 0 : index
      %23 = vector.load %arg7[%c0_20, %c0_21] : memref<8x128xf32, #tpu.memory_space<vmem>>, vector<8x128xf32>
      tpu.vector_store %arg7[%c0_20, %c0_21], %22 {strides = array<i32>} : memref<8x128xf32, #tpu.memory_space<vmem>>, vector<8x128xf32>,
    } else {
    }
    return
  }
  func.func @transform_0(%arg0: i32, %arg1: i32) -> (i32, i32) {
    %c0_i32 = arith.constant 0 : i32
    %c0_i32_0 = arith.constant 0 : i32
    return %arg0, %c0_i32 : i32, i32
  }
  func.func @transform_1(%arg0: i32, %arg1: i32) -> (i32, i32) {
    %c0_i32 = arith.constant 0 : i32
    %c0_i32_0 = arith.constant 0 : i32
    return %c0_i32, %arg1 : i32, i32
  }
  func.func @transform_2(%arg0: i32, %arg1: i32) -> (i32, i32) {
    %c0_i32 = arith.constant 0 : i32
    %c0_i32_0 = arith.constant 0 : i32
    return %c0_i32, %arg1 : i32, i32
  }
  func.func @transform_3(%arg0: i32, %arg1: i32) -> (i32, i32) {
    %c0_i32 = arith.constant 0 : i32
    %c0_i32_0 = arith.constant 0 : i32
    return %arg1, %c0_i32 : i32, i32
  }
  func.func @transform_4(%arg0: i32, %arg1: i32) -> (i32, i32) {
    %c0_i32 = arith.constant 0 : i32
    %c0_i32_0 = arith.constant 0 : i32
    %c0_i32_1 = arith.constant 0 : i32
    return %c0_i32, %c0_i32_0 : i32, i32
  }
  func.func @transform_5(%arg0: i32, %arg1: i32) -> (i32, i32) {
    %c0_i32 = arith.constant 0 : i32
    %c0_i32_0 = arith.constant 0 : i32
    return %arg0, %c0_i32 : i32, i32
  }
}

</mosaic_0001>

<bundles_post_ra>
// kernel: tpu_custom_call.1
= control target key start
LH: loop header
LB: loop body
LE: loop exit
PB: predicated region body
PF: predicated region fallthrough
CT: control target
= control target key end

     0   :  { %10 = vsyncpa [#allocation4], 0  ;;  %s568_s0 = inlined_call_operand.hbm [shape: f32[8,128], index: 0, kind: input, shape index: {}]   ;;  %s569_s1 = inlined_call_operand.hbm [shape: f32[128,128], index: 1, kind: input, shape index: {}]   ;;  %s570_s2 = inlined_call_operand.vmem [shape: f32[1,128], index: 2, kind: input, shape index: {}]   ;;  %s571_s3 = inlined_call_operand.hbm [shape: f32[128,128], index: 3, kind: input, shape index: {}]   ;;  %s572_s4 = inlined_call_operand.vmem [shape: f32[1,128], index: 4, kind: input, shape index: {}]   ;;  %s573_s5 = inlined_call_operand.hbm [shape: f32[8,128], index: 5, kind: output, shape index: {}]  }
   0x1   :  { %11 = vsyncpa [#allocation7], 0 }
   0x2   :  { %12 = vsyncpa [#allocation5], 0  ;;  %s478_s18 = smov [#allocation6]  }
   0x3   :  { %s28_s19 = sshll.u32 %s478_s18, 4  ;;  %s29_s19 = int_to_ptr.vmem [resolvable:$true] %s28_s19 }
   0x4   :  { %s400_s20 = scalar_lea.vmem %s29_s19, 2048  ;;  %p405_p1 = scmp.lt.s32.totalorder %s29_s19, %s29_s19 }
   0x5   :  { %p401_p0 = scmp.ne.s32.totalorder %s29_s19, %s400_s20  ;;  %p406_p2 = scmp.lt.s32.totalorder %s400_s20, %s400_s20 }
   0x7   :  { %p407_p3 = por %p406_p2, %p405_p1 }
   0x9   :  { %p408_p4 = pnand %p407_p3, %p401_p0 }
   0xb   :  { %411 = shalt.err (!%p408_p4)
}
   0xc   :  { %s479_s21 = smov 128   ;;  %s480_s22 = smov 8  }
   0xd   :  { %34 = dma.hbm_to_vmem [thread:$0]  %s569_s1, 2048, %s29_s19, [#allocation7], %s479_s21, %s479_s21, %s480_s22  }
   0xe   :  { %s481_s25 = smov [#allocation3]   ;;  %s482_s27 = smov [#allocation8]  }
   0xf   :  { %s19_s26 = sshll.u32 %s481_s25, 4  ;;  %s42_s28 = sshll.u32 %s482_s27, 4  ;;  %s20_s26 = int_to_ptr.vmem [resolvable:$true] %s19_s26  ;;  %s43_s28 = int_to_ptr.vmem [resolvable:$true] %s42_s28 }
  0x10   :  { %s420_s29 = scalar_lea.vmem %s20_s26, 128  ;;  %p425_p6 = scmp.lt.s32.totalorder %s20_s26, %s20_s26 }
  0x11   :  { %p421_p5 = scmp.ne.s32.totalorder %s20_s26, %s420_s29  ;;  %p426_p7 = scmp.lt.s32.totalorder %s420_s29, %s420_s29 }
  0x13   :  { %p427_p8 = por %p426_p7, %p425_p6 }
  0x15   :  { %p428_p9 = pnand %p427_p8, %p421_p5 }
  0x17   :  { %431 = shalt.err (!%p428_p9)
}
  0x18   :  { %22 = dma.hbm_to_vmem [thread:$0]  %s568_s0, 128, %s20_s26, [#allocation4]  }
  0x19   :  { %s440_s7 = scalar_lea.vmem %s43_s28, 2048  ;;  %p445_p11 = scmp.lt.s32.totalorder %s43_s28, %s43_s28 }
  0x1a   :  { %p441_p10 = scmp.ne.s32.totalorder %s43_s28, %s440_s7  ;;  %p446_p12 = scmp.lt.s32.totalorder %s440_s7, %s440_s7 }
  0x1c   :  { %p447_p13 = por %p446_p12, %p445_p11 }
  0x1e   :  { %p448_p0 = pnand %p447_p13, %p441_p10 }
  0x20   :  { %451 = shalt.err (!%p448_p0)
}
  0x21   :  { %48 = dma.hbm_to_vmem [thread:$0]  %s571_s3, 2048, %s43_s28, [#allocation7], %s479_s21, %s479_s21, %s480_s22  }
  0x22   :  { %472 = dma.done.wait [#allocation4], 128  }
  0x23   :  { %473 = vsyncadd [#allocation4], 4294967168 }
  0x24   :  { %474 = dma.done.wait [#allocation7], 4096  }
  0x25   :  { %475 = vsyncadd [#allocation7], 4294963200  ;;  %v483_v0 = vmov 0.0   ;;  %vm484_vm0 = vmmov 0   ;;  %v81_v1 = vld [vmem:[#allocation6 + $0x78] sm:$0xff]  ;;  %v80_v2 = vld [vmem:[#allocation6 + $0x70] sm:$0xff] }
  0x26   :  { %314 = vmatprep.subr.mxu0 %v483_v0  ;;  %346 = vmatprep.mubr.msk.f32.mxu0 %vm484_vm0, %v483_v0  ;;  %v79_v3 = vld [vmem:[#allocation6 + $0x68] sm:$0xff]  ;;  %v78_v4 = vld [vmem:[#allocation6 + $0x60] sm:$0xff]  ;;  %v176_v5 = vld [vmem:[#allocation8 + $0x78] sm:$0xff]  ;;  %s485_s11 = smov [#allocation9]  }
  0x27   :  { %349 = vmatprep.subr.mxu1 %v483_v0  ;;  %381 = vmatprep.mubr.msk.f32.mxu1 %vm484_vm0, %v483_v0  ;;  %v77_v6 = vld [vmem:[#allocation6 + $0x58] sm:$0xff]  ;;  %v175_v7 = vld [vmem:[#allocation8 + $0x70] sm:$0xff]  ;;  %v174_v8 = vld [vmem:[#allocation8 + $0x68] sm:$0xff]  ;;  %s268_s12 = sshll.u32 %s485_s11, 4  ;;  %s269_s12 = int_to_ptr.vmem [resolvable:$true] %s268_s12 }
  0x28   :  { %315 = vmatpush3.msra.mxu0 %v81_v1  ;;  %350 = vmatpush3.msra.mxu1 %v176_v5  ;;  %v76_v9 = vld [vmem:[#allocation6 + $0x50] sm:$0xff]  ;;  %v173_v10 = vld [vmem:[#allocation8 + $0x60] sm:$0xff]  ;;  %v75_v11 = vld [vmem:[#allocation6 + $0x48] sm:$0xff]  ;;  %s452_s13 = scalar_lea.vmem %s269_s12, 128  ;;  %p457_p2 = scmp.lt.s32.totalorder %s269_s12, %s269_s12 }
  0x29   :  { %316 = vmatprep.subr.mxu0 %v483_v0  ;;  %351 = vmatprep.subr.mxu1 %v483_v0  ;;  %v172_v12 = vld [vmem:[#allocation8 + $0x58] sm:$0xff]  ;;  %v74_v13 = vld [vmem:[#allocation6 + $0x40] sm:$0xff]  ;;  %v171_v14 = vld [vmem:[#allocation8 + $0x50] sm:$0xff]  ;;  %p453_p1 = scmp.ne.s32.totalorder %s269_s12, %s452_s13  ;;  %p458_p3 = scmp.lt.s32.totalorder %s452_s13, %s452_s13 }
  0x2a   :  { %317 = vmatpush3.msra.mxu0 %v80_v2  ;;  %352 = vmatpush3.msra.mxu1 %v175_v7  ;;  %v73_v15 = vld [vmem:[#allocation6 + $0x38] sm:$0xff]  ;;  %v170_v16 = vld [vmem:[#allocation8 + $0x48] sm:$0xff]  ;;  %v72_v17 = vld [vmem:[#allocation6 + $0x30] sm:$0xff] }
  0x2b   :  { %318 = vmatprep.subr.mxu0 %v483_v0  ;;  %353 = vmatprep.subr.mxu1 %v483_v0  ;;  %v169_v18 = vld [vmem:[#allocation8 + $0x40] sm:$0xff]  ;;  %v71_v19 = vld [vmem:[#allocation6 + $0x28] sm:$0xff]  ;;  %v168_v20 = vld [vmem:[#allocation8 + $0x38] sm:$0xff]  ;;  %p459_p4 = por %p458_p3, %p457_p2 }
  0x2c   :  { %319 = vmatpush3.msra.mxu0 %v79_v3  ;;  %354 = vmatpush3.msra.mxu1 %v174_v8  ;;  %v70_v21 = vld [vmem:[#allocation6 + $0x20] sm:$0xff]  ;;  %v167_v22 = vld [vmem:[#allocation8 + $0x30] sm:$0xff]  ;;  %v69_v23 = vld [vmem:[#allocation6 + $0x18] sm:$0xff] }
  0x2d   :  { %320 = vmatprep.subr.mxu0 %v483_v0  ;;  %355 = vmatprep.subr.mxu1 %v483_v0  ;;  %v166_v24 = vld [vmem:[#allocation8 + $0x28] sm:$0xff]  ;;  %v68_v25 = vld [vmem:[#allocation6 + $0x10] sm:$0xff]  ;;  %v165_v26 = vld [vmem:[#allocation8 + $0x20] sm:$0xff]  ;;  %p460_p5 = pnand %p459_p4, %p453_p1 }
  0x2e   :  { %321 = vmatpush3.msra.mxu0 %v78_v4  ;;  %356 = vmatpush3.msra.mxu1 %v173_v10  ;;  %v67_v27 = vld [vmem:[#allocation6 + $0x8] sm:$0xff]  ;;  %v164_v28 = vld [vmem:[#allocation8 + $0x18] sm:$0xff]  ;;  %v66_v29 = vld [vmem:[#allocation6] sm:$0xff] }
  0x2f   :  { %322 = vmatprep.subr.mxu0 %v483_v0  ;;  %357 = vmatprep.subr.mxu1 %v483_v0  ;;  %v65_v30 = vld [vmem:[#allocation3] sm:$0xff]  ;;  %v163_v31 = vld [vmem:[#allocation8 + $0x10] sm:$0xff]  ;;  %v162_v32 = vld [vmem:[#allocation8 + $0x8] sm:$0xff] }
  0x30   :  { %323 = vmatpush3.msra.mxu0 %v77_v6  ;;  %358 = vmatpush3.msra.mxu1 %v172_v12  ;;  %v161_v33 = vld [vmem:[#allocation8] sm:$0xff]  ;;  %v278_v34 = vld [vmem:[%s570_s2] ss:$0 sm:$0xff] }
  0x31   :  { %324 = vmatprep.subr.mxu0 %v483_v0  ;;  %359 = vmatprep.subr.mxu1 %v483_v0  ;;  %v279_v39 = vld [vmem:[%s572_s4] ss:$0 sm:$0xff] }
  0x32   :  { %325 = vmatpush3.msra.mxu0 %v76_v9  ;;  %360 = vmatpush3.msra.mxu1 %v171_v14 }
  0x33   :  { %326 = vmatprep.subr.mxu0 %v483_v0  ;;  %361 = vmatprep.subr.mxu1 %v483_v0 }
  0x34   :  { %327 = vmatpush3.msra.mxu0 %v75_v11  ;;  %362 = vmatpush3.msra.mxu1 %v170_v16 }
  0x35   :  { %328 = vmatprep.subr.mxu0 %v483_v0  ;;  %363 = vmatprep.subr.mxu1 %v483_v0 }
  0x36   :  { %329 = vmatpush3.msra.mxu0 %v74_v13  ;;  %364 = vmatpush3.msra.mxu1 %v169_v18 }
  0x37   :  { %330 = vmatprep.subr.mxu0 %v483_v0  ;;  %365 = vmatprep.subr.mxu1 %v483_v0 }
  0x38   :  { %331 = vmatpush3.msra.mxu0 %v73_v15  ;;  %366 = vmatpush3.msra.mxu1 %v168_v20 }
  0x39   :  { %332 = vmatprep.subr.mxu0 %v483_v0  ;;  %367 = vmatprep.subr.mxu1 %v483_v0 }
  0x3a   :  { %333 = vmatpush3.msra.mxu0 %v72_v17  ;;  %368 = vmatpush3.msra.mxu1 %v167_v22 }
  0x3b   :  { %334 = vmatprep.subr.mxu0 %v483_v0  ;;  %369 = vmatprep.subr.mxu1 %v483_v0 }
  0x3c   :  { %335 = vmatpush3.msra.mxu0 %v71_v19  ;;  %370 = vmatpush3.msra.mxu1 %v166_v24 }
  0x3d   :  { %336 = vmatprep.subr.mxu0 %v483_v0  ;;  %371 = vmatprep.subr.mxu1 %v483_v0 }
  0x3e   :  { %337 = vmatpush3.msra.mxu0 %v70_v21  ;;  %372 = vmatpush3.msra.mxu1 %v165_v26 }
  0x3f   :  { %338 = vmatprep.subr.mxu0 %v483_v0  ;;  %373 = vmatprep.subr.mxu1 %v483_v0 }
  0x40   :  { %339 = vmatpush3.msra.mxu0 %v69_v23  ;;  %374 = vmatpush3.msra.mxu1 %v164_v28 }
  0x41   :  { %340 = vmatprep.subr.mxu0 %v483_v0  ;;  %375 = vmatprep.subr.mxu1 %v483_v0 }
  0x42   :  { %341 = vmatpush3.msra.mxu0 %v68_v25  ;;  %376 = vmatpush3.msra.mxu1 %v163_v31 }
  0x43   :  { %342 = vmatprep.subr.mxu0 %v483_v0  ;;  %377 = vmatprep.subr.mxu1 %v483_v0 }
  0x44   :  { %343 = vmatpush3.msra.mxu0 %v67_v27  ;;  %378 = vmatpush3.msra.mxu1 %v162_v32 }
  0x45   :  { %344 = vmatprep.subr.mxu0 %v483_v0  ;;  %379 = vmatprep.subr.mxu1 %v483_v0 }
  0x46   :  { %345 = vmatpush3.msra.mxu0 %v66_v29  ;;  %380 = vmatpush3.msra.mxu1 %v161_v33 }
  0x47   :  { %347 = vmatmul.mubr.f32.vlgmr.msra.gmra.mxu0 %v65_v30 }
 0x107   :  { %v155_v35 = vpop.f32.mrf.mxu0 }
 0x108   :  { %v156_v36 = vadd.f32 %v278_v34, %v155_v35 }
 0x109   :  { %v348_v37 = vpop.f32.mrf.mxu0 }
 0x10a   :  { %v159_v38 = vmax.f32 %v156_v36, 0.0 }
 0x10c   :  { %382 = vmatmul.mubr.f32.vlgmr.msra.gmra.mxu1 %v159_v38 }
 0x1cc   :  { %v243_v40 = vpop.f32.mrf.mxu1 }
 0x1cd   :  { %v260_v41 = vadd.f32 %v279_v39, %v243_v40 }
 0x1ce   :  { %v383_v42 = vpop.f32.mrf.mxu1 }
 0x1cf   :  { %261 = vst [vmem:[#allocation9] sm:$0xff] %v260_v41 }
 0x1d0   :  { %463 = shalt.err (!%p460_p5)
}
 0x1d1   :  { %271 = dma.vmem_to_hbm [thread:$0]  %s269_s12, 128, %s573_s5, [#allocation5]  }
 0x1d2   :  { %476 = dma.done.wait [#allocation5], 128  }
 0x1d3   :  { %477 = vsyncadd [#allocation5], 4294967168 }
 0x1d4   :  { %275 = vsyncpa [#allocation4], 1 }
 0x1d5   :  { %276 = vsyncpa [#allocation7], 1 }
 0x1d6   :  { %277 = vsyncpa [#allocation5], 1 }

</bundles_post_ra>
